<compile_context>
chip_gen: v6e
topology: v6e:2x2x1
jax: 0.10.0
libtpu: 0.0.40
codegen_flags: <defaults>
</compile_context>

<pallas_src>
import functools

import jax
import jax.numpy as jnp
from jax.experimental import pallas as pl
from jax.experimental.pallas import tpu as pltpu

HIDDEN_PAD = 128       # hidden dim padded to a full lane width
ACTION_PAD = 128       # action lanes padded to a full lane width (compute only)
NEG_BIG = -1e30        # mask value baked into padded b2 lanes (finite, not -inf)


def policy_net_kernel(x_ref, w1_ref, b1_ref, w2_ref, b2_ref, out_ref, *, action_dim):
    x = x_ref[...]                                               # (tb, state_dim) f32
    # fc1 + ReLU (MXU matmul, f32 accumulation); padded hidden cols are exact 0.
    h = jnp.dot(x, w1_ref[...], preferred_element_type=jnp.float32) + b1_ref[...]
    h = jnp.maximum(h, 0.0)                                      # (tb, 128)
    # fc2: padded w2 cols are 0 and padded b2 lanes are -1e30, so padded-lane
    # logits are already masked -- no iota/where needed.
    logits = jnp.dot(h, w2_ref[...], preferred_element_type=jnp.float32) + b2_ref[...]
    # Numerically stable softmax over the action axis (exact reciprocal).
    m = jnp.max(logits, axis=-1, keepdims=True)
    e = jnp.exp(logits - m)
    probs = e / jnp.sum(e, axis=-1, keepdims=True)               # (tb, 128)
    # Store only the real action lanes -> 64x less HBM writeback.
    out_ref[...] = probs[:, :action_dim].astype(out_ref.dtype)


def pad_params(w1, b1, w2, b2):
    """Call ONCE (at init / after each optimizer step), reuse for every forward."""
    state_dim, hidden_dim = w1.shape
    hidden_dim2, action_dim = w2.shape
    assert hidden_dim == hidden_dim2
    b1 = jnp.asarray(b1, jnp.float32).reshape(1, hidden_dim)
    b2 = jnp.asarray(b2, jnp.float32).reshape(1, action_dim)
    w1p = jnp.zeros((state_dim, HIDDEN_PAD), jnp.float32).at[:, :hidden_dim].set(w1)
    b1p = jnp.zeros((1, HIDDEN_PAD), jnp.float32).at[:, :hidden_dim].set(b1)
    w2p = jnp.zeros((HIDDEN_PAD, ACTION_PAD), jnp.float32).at[:hidden_dim, :action_dim].set(w2)
    # Bake the softmax mask for padded action lanes directly into the bias.
    b2p = jnp.full((1, ACTION_PAD), NEG_BIG, jnp.float32).at[:, :action_dim].set(b2)
    return (w1p, b1p, w2p, b2p), action_dim


@functools.partial(jax.jit, static_argnames=("action_dim", "row_tile"))
def policy_net_forward(x, padded_params, *, action_dim, row_tile=4096):
    """x: (batch, state_dim); padded_params from pad_params(); returns (batch, action_dim)."""
    w1p, b1p, w2p, b2p = padded_params
    batch, state_dim = x.shape

    # --- batch tiling -------------------------------------------------------
    # Row tile: multiple of 8, capped at row_tile.  When the rounded batch is
    # >= 16, cap at half the batch so the grid has >= 2 steps and the
    # "parallel" batch axis can be split across v7x's two TensorCores.
    b8 = ((batch + 7) // 8) * 8
    tb = min(row_tile, b8)
    if b8 >= 16:
        tb = min(tb, (((b8 + 1) // 2 + 7) // 8) * 8)
    tb = max(8, (tb // 8) * 8)
    padded_batch = ((batch + tb - 1) // tb) * tb

    xp = x.astype(jnp.float32)
    if padded_batch != batch:
        xp = jnp.zeros((padded_batch, state_dim), jnp.float32).at[:batch].set(xp)

    grid = (padded_batch // tb,)
    kernel = functools.partial(policy_net_kernel, action_dim=action_dim)

    # Weights/biases: whole-array blocks with constant index_map -> DMA'd once,
    # VMEM-resident across all batch tiles (no re-DMA between grid steps).
    const2d = lambda shape: pl.BlockSpec(shape, lambda i: (0, 0))

    outp = pl.pallas_call(
        kernel,
        out_shape=jax.ShapeDtypeStruct((padded_batch, action_dim), jnp.float32),
        grid=grid,
        in_specs=[
            pl.BlockSpec((tb, state_dim), lambda i: (i, 0)),     # activations, batch-tiled
            const2d((state_dim, HIDDEN_PAD)),
            const2d((1, HIDDEN_PAD)),
            const2d((HIDDEN_PAD, ACTION_PAD)),
            const2d((1, ACTION_PAD)),
        ],
        # Narrow output block: last dim equals the full array dim (legal), so
        # only action_dim * 4 bytes per row go back to HBM.
        out_specs=pl.BlockSpec((tb, action_dim), lambda i: (i, 0)),
        compiler_params=pltpu.CompilerParams(
            dimension_semantics=("parallel",),   # shards batch tiles across TCs on v7x
        ),
    )(xp, w1p, b1p, w2p, b2p)

    return outp[:batch]


def init_params(key, state_dim, hidden_dim, action_dim):
    # Deterministic PyTorch-style uniform(-1/sqrt(fan_in), 1/sqrt(fan_in)) init.
    k1, k2, k3, k4 = jax.random.split(key, 4)
    bound1 = 1.0 / jnp.sqrt(state_dim)
    bound2 = 1.0 / jnp.sqrt(hidden_dim)
    w1 = jax.random.uniform(k1, (state_dim, hidden_dim), jnp.float32, -bound1, bound1)
    b1 = jax.random.uniform(k2, (1, hidden_dim), jnp.float32, -bound1, bound1)
    w2 = jax.random.uniform(k3, (hidden_dim, action_dim), jnp.float32, -bound2, bound2)
    b2 = jax.random.uniform(k4, (1, action_dim), jnp.float32, -bound2, bound2)
    return w1, b1, w2, b2


if __name__ == "__main__":
    # Small shapes consistent with a CartPole-style REINFORCE policy net.
    batch, state_dim, hidden_dim, action_dim = 8, 4, 64, 2

    key = jax.random.PRNGKey(0)
    kx, kp = jax.random.split(key)
    x = jax.random.normal(kx, (batch, state_dim), jnp.float32)
    w1, b1, w2, b2 = init_params(kp, state_dim, hidden_dim, action_dim)

    # Pad / mask the parameters ONCE; reuse for every forward call.
    padded_params, adim = pad_params(w1, b1, w2, b2)

    out = policy_net_forward(x, padded_params, action_dim=adim)
    out = jax.block_until_ready(out)

    # Reference check in plain JAX (same semantics as the PyTorch forward).
    h_ref = jnp.maximum(x @ w1 + b1, 0.0)
    ref = jax.nn.softmax(h_ref @ w2 + b2, axis=1)
    assert out.shape == (batch, action_dim)
    assert jnp.allclose(out, ref, atol=1e-5, rtol=1e-5), "mismatch vs reference"
    assert jnp.allclose(jnp.sum(out, axis=1), 1.0, atol=1e-5)

    # Exercise a second, larger batch (>= 2 grid steps path) with the SAME
    # cached padded params to confirm the tiled/parallel configuration runs.
    x_big = jax.random.normal(jax.random.PRNGKey(1), (300, state_dim), jnp.float32)
    out_big = jax.block_until_ready(
        policy_net_forward(x_big, padded_params, action_dim=adim))
    ref_big = jax.nn.softmax(jnp.maximum(x_big @ w1 + b1, 0.0) @ w2 + b2, axis=1)
    assert out_big.shape == (300, action_dim)
    assert jnp.allclose(out_big, ref_big, atol=1e-5, rtol=1e-5)

    print("KERNEL_OK")
</pallas_src>

<mosaic_0001>
module attributes {stable_mosaic.version = 11 : i64} {
  func.func @policy_net_kernel(%arg0: i32, %arg1: memref<8x4xf32, #tpu.memory_space<vmem>>, %arg2: memref<4x128xf32, #tpu.memory_space<vmem>>, %arg3: memref<1x128xf32, #tpu.memory_space<vmem>>, %arg4: memref<128x128xf32, #tpu.memory_space<vmem>>, %arg5: memref<1x128xf32, #tpu.memory_space<vmem>>, %arg6: memref<8x2xf32, #tpu.memory_space<vmem>>) attributes {dimension_semantics = [#tpu.dimension_semantics<parallel>], iteration_bounds = array<i64: 1>, scalar_prefetch = 0 : i64, scratch_operands = 0 : i64, tpu.core_type = #tpu.core_type<tc>, window_params = [{transform_indices = @transform_0, window_bounds = array<i64: 8, 4>}, {pipeline_mode = #tpu.pipeline_mode<synchronous>, transform_indices = @transform_1, window_bounds = array<i64: 4, 128>}, {pipeline_mode = #tpu.pipeline_mode<synchronous>, transform_indices = @transform_2, window_bounds = array<i64: 1, 128>}, {pipeline_mode = #tpu.pipeline_mode<synchronous>, transform_indices = @transform_3, window_bounds = array<i64: 128, 128>}, {pipeline_mode = #tpu.pipeline_mode<synchronous>, transform_indices = @transform_4, window_bounds = array<i64: 1, 128>}, {transform_indices = @transform_5, window_bounds = array<i64: 8, 2>}]} {
    %c0 = arith.constant 0 : index
    %c0_0 = arith.constant 0 : index
    %0 = vector.load %arg1[%c0, %c0_0] : memref<8x4xf32, #tpu.memory_space<vmem>>, vector<8x4xf32>
    %c0_1 = arith.constant 0 : index
    %c0_2 = arith.constant 0 : index
    %1 = vector.load %arg2[%c0_1, %c0_2] : memref<4x128xf32, #tpu.memory_space<vmem>>, vector<4x128xf32>
    %cst = arith.constant dense<0.000000e+00> : vector<8x128xf32>
    %2 = tpu.matmul %0, %1, %cst {dimension_numbers = #tpu.dot_dimension_numbers<[1], [0], [0], [1], [0, 0, 1, 1], [], []>} : vector<8x4xf32>, vector<4x128xf32>, vector<8x128xf32> -> vector<8x128xf32>
    %c0_3 = arith.constant 0 : index
    %c0_4 = arith.constant 0 : index
    %3 = vector.load %arg3[%c0_3, %c0_4] : memref<1x128xf32, #tpu.memory_space<vmem>>, vector<1x128xf32>
    %4 = vector.broadcast %3 : vector<1x128xf32> to vector<8x128xf32>
    %5 = arith.addf %2, %4 : vector<8x128xf32>
    %cst_5 = arith.constant 0.000000e+00 : f32
    %6 = vector.broadcast %cst_5 : f32 to vector<8x128xf32>
    %7 = arith.maximumf %5, %6 : vector<8x128xf32>
    %c0_6 = arith.constant 0 : index
    %c0_7 = arith.constant 0 : index
    %8 = vector.load %arg4[%c0_6, %c0_7] : memref<128x128xf32, #tpu.memory_space<vmem>>, vector<128x128xf32>
    %cst_8 = arith.constant dense<0.000000e+00> : vector<8x128xf32>
    %9 = tpu.matmul %7, %8, %cst_8 {dimension_numbers = #tpu.dot_dimension_numbers<[1], [0], [0], [1], [0, 0, 1, 1], [], []>} : vector<8x128xf32>, vector<128x128xf32>, vector<8x128xf32> -> vector<8x128xf32>
    %c0_9 = arith.constant 0 : index
    %c0_10 = arith.constant 0 : index
    %10 = vector.load %arg5[%c0_9, %c0_10] : memref<1x128xf32, #tpu.memory_space<vmem>>, vector<1x128xf32>
    %11 = vector.broadcast %10 : vector<1x128xf32> to vector<8x128xf32>
    %12 = arith.addf %9, %11 : vector<8x128xf32>
    %cst_11 = arith.constant dense<0xFF800000> : vector<8xf32>
    %13 = vector.multi_reduction <maximumf>, %12, %cst_11 [1] : vector<8x128xf32> to vector<8xf32>
    %14 = vector.shape_cast %13 : vector<8xf32> to vector<8x1xf32>
    %15 = vector.broadcast %14 : vector<8x1xf32> to vector<8x128xf32>
    %16 = arith.subf %12, %15 : vector<8x128xf32>
    %17 = math.exp %16 : vector<8x128xf32>
    %cst_12 = arith.constant dense<0.000000e+00> : vector<8xf32>
    %18 = vector.multi_reduction <add>, %17, %cst_12 [1] : vector<8x128xf32> to vector<8xf32>
    %19 = vector.shape_cast %18 : vector<8xf32> to vector<8x1xf32>
    %20 = vector.broadcast %19 : vector<8x1xf32> to vector<8x128xf32>
    %21 = arith.divf %17, %20 : vector<8x128xf32>
    %22 = vector.extract_strided_slice %21 {offsets = [0, 0], sizes = [8, 2], strides = [1, 1]} : vector<8x128xf32> to vector<8x2xf32>
    %c0_13 = arith.constant 0 : index
    %c0_14 = arith.constant 0 : index
    %23 = vector.load %arg6[%c0_13, %c0_14] : memref<8x2xf32, #tpu.memory_space<vmem>>, vector<8x2xf32>
    tpu.vector_store %arg6[%c0_13, %c0_14], %22 {strides = array<i32>} : memref<8x2xf32, #tpu.memory_space<vmem>>, vector<8x2xf32>,
    return
  }
  func.func @transform_0(%arg0: i32) -> (i32, i32) {
    %c0_i32 = arith.constant 0 : i32
    %c0_i32_0 = arith.constant 0 : i32
    return %arg0, %c0_i32 : i32, i32
  }
  func.func @transform_1(%arg0: i32) -> (i32, i32) {
    %c0_i32 = arith.constant 0 : i32
    %c0_i32_0 = arith.constant 0 : i32
    %c0_i32_1 = arith.constant 0 : i32
    return %c0_i32, %c0_i32_0 : i32, i32
  }
  func.func @transform_2(%arg0: i32) -> (i32, i32) {
    %c0_i32 = arith.constant 0 : i32
    %c0_i32_0 = arith.constant 0 : i32
    %c0_i32_1 = arith.constant 0 : i32
    return %c0_i32, %c0_i32_0 : i32, i32
  }
  func.func @transform_3(%arg0: i32) -> (i32, i32) {
    %c0_i32 = arith.constant 0 : i32
    %c0_i32_0 = arith.constant 0 : i32
    %c0_i32_1 = arith.constant 0 : i32
    return %c0_i32, %c0_i32_0 : i32, i32
  }
  func.func @transform_4(%arg0: i32) -> (i32, i32) {
    %c0_i32 = arith.constant 0 : i32
    %c0_i32_0 = arith.constant 0 : i32
    %c0_i32_1 = arith.constant 0 : i32
    return %c0_i32, %c0_i32_0 : i32, i32
  }
  func.func @transform_5(%arg0: i32) -> (i32, i32) {
    %c0_i32 = arith.constant 0 : i32
    %c0_i32_0 = arith.constant 0 : i32
    return %arg0, %c0_i32 : i32, i32
  }
}

</mosaic_0001>

<bundles_post_ra>
// kernel: policy_net_forward.1
= control target key start
LH: loop header
LB: loop body
LE: loop exit
PB: predicated region body
PF: predicated region fallthrough
CT: control target
= control target key end

     0   :  { %10 = vsyncpa [#allocation3], 0  ;;  %s325_s18 = smov [#allocation2]   ;;  %s378_s0 = inlined_call_operand.vmem [shape: f32[8,4], index: 0, kind: input, shape index: {}]   ;;  %s379_s1 = inlined_call_operand.vmem [shape: f32[4,128], index: 1, kind: input, shape index: {}]   ;;  %s380_s2 = inlined_call_operand.vmem [shape: f32[1,128], index: 2, kind: input, shape index: {}]   ;;  %s381_s3 = inlined_call_operand.hbm [shape: f32[128,128], index: 3, kind: input, shape index: {}]   ;;  %s382_s4 = inlined_call_operand.vmem [shape: f32[1,128], index: 4, kind: input, shape index: {}]   ;;  %s383_s5 = inlined_call_operand.vmem [shape: f32[8,2], index: 5, kind: output, shape index: {}]  }
   0x1   :  { %s22_s19 = sshll.u32 %s325_s18, 4  ;;  %s23_s19 = int_to_ptr.vmem [resolvable:$true] %s22_s19 }
   0x2   :  { %s311_s20 = scalar_lea.vmem %s23_s19, 2048  ;;  %p316_p1 = scmp.lt.s32.totalorder %s23_s19, %s23_s19 }
   0x3   :  { %p312_p0 = scmp.ne.s32.totalorder %s23_s19, %s311_s20  ;;  %p317_p2 = scmp.lt.s32.totalorder %s311_s20, %s311_s20 }
   0x5   :  { %p318_p3 = por %p317_p2, %p316_p1 }
   0x7   :  { %p319_p4 = pnand %p318_p3, %p312_p0 }
   0x9   :  { %322 = shalt.err (!%p319_p4)
}
   0xa   :  { %s326_s21 = smov 128   ;;  %s327_s22 = smov 8  }
   0xb   :  { %28 = dma.hbm_to_vmem [thread:$0]  %s381_s3, 2048, %s23_s19, [#allocation3], %s326_s21, %s326_s21, %s327_s22  }
   0xc   :  { %323 = dma.done.wait [#allocation3], 2048  }
   0xd   :  { %324 = vsyncadd [#allocation3], 4294965248  ;;  %v328_v0 = vmov 0.0   ;;  %vm329_vm0 = vmmov 0   ;;  %vm47_vm1 = vcmask 1043456   ;;  %vm43_vm2 = vcmask 31744  }
   0xe   :  { %254 = vmatprep.subr.mxu0 %v328_v0  ;;  %256 = vmatprep.mubr.msk.f32.mxu0 %vm329_vm0, %v328_v0  ;;  %v35_v1 = vld [vmem:[%s379_s1] sm:$0xf]  ;;  %v137_v3 = vld [vmem:[#allocation2 + $0x78] sm:$0xff]  ;;  %v136_v4 = vld [vmem:[#allocation2 + $0x70] sm:$0xff]  ;;  %vm224_vm3 = vcmask 15360  }
   0xf   :  { %259 = vmatprep.subr.mxu1 %v328_v0  ;;  %291 = vmatprep.mubr.msk.f32.mxu1 %vm329_vm0, %v328_v0  ;;  %v34_v2 = vld [vmem:[%s378_s0] sm:$0xff]  ;;  %v135_v5 = vld [vmem:[#allocation2 + $0x68] sm:$0xff]  ;;  %v133_v7 = vld [vmem:[#allocation2 + $0x58] sm:$0xff] }
  0x10   :  { %255 = vmatpush3.msk.msra.mxu0 %vm47_vm1, %v35_v1  ;;  %260 = vmatpush3.msra.mxu1 %v137_v3  ;;  %v134_v6 = vld [vmem:[#allocation2 + $0x60] sm:$0xff]  ;;  %v132_v8 = vld [vmem:[#allocation2 + $0x50] sm:$0xff]  ;;  %v131_v9 = vld [vmem:[#allocation2 + $0x48] sm:$0xff] }
  0x11   :  { %257 = vmatmul.mubr.msk.f32.vlgmr.msra.gmra.mxu0 %vm43_vm2, %v34_v2  ;;  %261 = vmatprep.subr.mxu1 %v328_v0  ;;  %v130_v10 = vld [vmem:[#allocation2 + $0x40] sm:$0xff]  ;;  %v129_v11 = vld [vmem:[#allocation2 + $0x38] sm:$0xff]  ;;  %v128_v12 = vld [vmem:[#allocation2 + $0x30] sm:$0xff] }
  0x12   :  { %262 = vmatpush3.msra.mxu1 %v136_v4  ;;  %v127_v13 = vld [vmem:[#allocation2 + $0x28] sm:$0xff]  ;;  %v126_v14 = vld [vmem:[#allocation2 + $0x20] sm:$0xff]  ;;  %v125_v15 = vld [vmem:[#allocation2 + $0x18] sm:$0xff] }
  0x13   :  { %263 = vmatprep.subr.mxu1 %v328_v0  ;;  %v124_v16 = vld [vmem:[#allocation2 + $0x10] sm:$0xff]  ;;  %v123_v17 = vld [vmem:[#allocation2 + $0x8] sm:$0xff]  ;;  %v122_v18 = vld [vmem:[#allocation2] sm:$0xff] }
  0x14   :  { %264 = vmatpush3.msra.mxu1 %v135_v5  ;;  %v231_v19 = vld [vmem:[%s380_s2] ss:$0 sm:$0xff] }
  0x15   :  { %265 = vmatprep.subr.mxu1 %v328_v0  ;;  %v234_v24 = vld [vmem:[%s382_s4] ss:$0 sm:$0xff] }
  0x16   :  { %266 = vmatpush3.msra.mxu1 %v134_v6 }
  0x17   :  { %267 = vmatprep.subr.mxu1 %v328_v0 }
  0x18   :  { %268 = vmatpush3.msra.mxu1 %v133_v7 }
  0x19   :  { %269 = vmatprep.subr.mxu1 %v328_v0 }
  0x1a   :  { %270 = vmatpush3.msra.mxu1 %v132_v8 }
  0x1b   :  { %271 = vmatprep.subr.mxu1 %v328_v0 }
  0x1c   :  { %272 = vmatpush3.msra.mxu1 %v131_v9 }
  0x1d   :  { %273 = vmatprep.subr.mxu1 %v328_v0 }
  0x1e   :  { %274 = vmatpush3.msra.mxu1 %v130_v10 }
  0x1f   :  { %275 = vmatprep.subr.mxu1 %v328_v0 }
  0x20   :  { %276 = vmatpush3.msra.mxu1 %v129_v11 }
  0x21   :  { %277 = vmatprep.subr.mxu1 %v328_v0 }
  0x22   :  { %278 = vmatpush3.msra.mxu1 %v128_v12 }
  0x23   :  { %279 = vmatprep.subr.mxu1 %v328_v0 }
  0x24   :  { %280 = vmatpush3.msra.mxu1 %v127_v13 }
  0x25   :  { %281 = vmatprep.subr.mxu1 %v328_v0 }
  0x26   :  { %282 = vmatpush3.msra.mxu1 %v126_v14 }
  0x27   :  { %283 = vmatprep.subr.mxu1 %v328_v0 }
  0x28   :  { %284 = vmatpush3.msra.mxu1 %v125_v15 }
  0x29   :  { %285 = vmatprep.subr.mxu1 %v328_v0 }
  0x2a   :  { %286 = vmatpush3.msra.mxu1 %v124_v16 }
  0x2b   :  { %287 = vmatprep.subr.mxu1 %v328_v0 }
  0x2c   :  { %288 = vmatpush3.msra.mxu1 %v123_v17 }
  0x2d   :  { %289 = vmatprep.subr.mxu1 %v328_v0 }
  0x2e   :  { %290 = vmatpush3.msra.mxu1 %v122_v18 }
  0xd1   :  { %v117_v20 = vpop.f32.mrf.mxu0 }
  0xd2   :  { %v118_v21 = vadd.f32 %v231_v19, %v117_v20 }
  0xd3   :  { %v258_v22 = vpop.f32.mrf.mxu0 }
  0xd4   :  { %v121_v23 = vmax.f32 %v118_v21, 0.0 }
  0xd6   :  { %292 = vmatmul.mubr.f32.vlgmr.msra.gmra.mxu1 %v121_v23 }
 0x196   :  { %v211_v25 = vpop.f32.mrf.mxu1 }
 0x197   :  { %v212_v26 = vadd.f32 %v234_v24, %v211_v25 }
 0x198   :  { %v293_v27 = vpop.f32.mrf.mxu1 }
 0x199   :  { %215 = vmax.xlane.f32.xlu0 %v212_v26 }
 0x222   :  { %v216_v28 = vpop.xlane.xlu0 %215 }
 0x223   :  { %v217_v29 = vsub.f32 %v212_v26, %v216_v28 }
 0x225   :  { %v218_v30 = vmul.f32 1.442695, %v217_v29 }
 0x227   :  { %299 = vpow2.f32 %v218_v30 }
 0x234   :  { %v300_v31 = vpop.eup %299 }
 0x235   :  { %220 = vadd.xlane.f32.xlu0 %v300_v31 }
 0x2be   :  { %v221_v32 = vpop.xlane.xlu0 %220 }
 0x2bf   :  { %301 = vrcp.f32 %v221_v32 }
 0x2cc   :  { %v302_v33 = vpop.eup %301 }
 0x2cd   :  { %v223_v34 = vmul.f32 %v302_v33, %v300_v31 }
 0x2cf   :  { %225 = vst.msk [vmem:[%s383_s5] sm:$0xff] %vm224_vm3, %v223_v34 }
 0x2d0   :  { %230 = vsyncpa [#allocation3], 1 }

</bundles_post_ra>
